<compile_context>
chip_gen: v6e
topology: v6e:2x2x1
jax: 0.10.0
libtpu: 0.0.40
codegen_flags: <defaults>
</compile_context>

<pallas_src>
import functools

import jax
import jax.numpy as jnp
from jax import lax
from jax.experimental import pallas as pl
from jax.experimental.pallas import tpu as pltpu

_SUB = 8
_LANE = 128
_TILE = _SUB * _LANE          # 1024 elements = one f32 vreg
_MAX_BLOCK_ROWS = 2048        # 2048 x 128 x 4B = 1 MiB per input block


def _bce_dice_kernel(p_ref, t_ref, out_ref, acc_ref, *,
                     block_rows, blocks_per_core, total_rows, needs_mask):
    i = pl.program_id(1)

    @pl.when(i == 0)
    def _init():
        acc_ref[...] = jnp.zeros_like(acc_ref)

    p = p_ref[...].astype(jnp.float32)
    t = t_ref[...].astype(jnp.float32)

    # torch.nn.BCELoss clamps log() at -100.
    log_p = jnp.maximum(jnp.log(p), -100.0)
    log_1mp = jnp.maximum(jnp.log(1.0 - p), -100.0)
    # -(t*log_p + (1-t)*log_1mp) == -(t*(log_p - log_1mp) + log_1mp)
    bce = -(t * (log_p - log_1mp) + log_1mp)
    pt = p * t
    ppt = p + t

    if needs_mask:
        # Mask rows belonging to logically out-of-range (overhanging /
        # clamped-duplicate) blocks so they contribute exactly zero.
        c = pl.program_id(0)
        blk = c * blocks_per_core + i                  # logical (unclamped)
        row0 = blk * block_rows
        row_ids = row0 + lax.broadcasted_iota(
            jnp.int32, (block_rows, _LANE), 0)
        valid = row_ids < total_rows
        zero = jnp.zeros_like(bce)
        bce = jnp.where(valid, bce, zero)
        pt = jnp.where(valid, pt, zero)
        ppt = jnp.where(valid, ppt, zero)

    # Fold the block down to one vreg per quantity with pure VPU adds.
    k = block_rows // _SUB
    acc_ref[0] += bce.reshape(k, _SUB, _LANE).sum(axis=0)
    acc_ref[1] += pt.reshape(k, _SUB, _LANE).sum(axis=0)
    acc_ref[2] += ppt.reshape(k, _SUB, _LANE).sum(axis=0)

    @pl.when(i == pl.num_programs(1) - 1)
    def _finalize():
        out_ref[0] = acc_ref[...]


def bce_dice_loss(pmask, rmask):
    """Pallas equivalent of BCE_DICE().forward(pmask, rmask)."""
    assert pmask.shape == rmask.shape
    n = int(pmask.size)

    # Keep native dtype; the kernel casts to f32 (halves HBM bytes for bf16).
    p = pmask.reshape(-1)
    t = rmask.reshape(-1)

    # Pad only up to one 1024-element tile so the (rows, 128) reshape exists;
    # zero padding contributes 0 to every accumulated quantity.
    padded = pl.cdiv(n, _TILE) * _TILE
    pad = padded - n
    if pad:
        p = jnp.pad(p, (0, pad))
        t = jnp.pad(t, (0, pad))

    rows = padded // _LANE                      # multiple of 8
    p2 = p.reshape(rows, _LANE)
    t2 = t.reshape(rows, _LANE)

    block_rows = min(_MAX_BLOCK_ROWS, rows)
    total_blocks = pl.cdiv(rows, block_rows)
    num_splits = 2 if total_blocks > 1 else 1   # feed both TCs on v7x
    bpc = pl.cdiv(total_blocks, num_splits)     # blocks per core
    needs_mask = (num_splits * bpc * block_rows) != rows

    def in_map(c, i):
        blk = c * bpc + i
        if needs_mask:
            blk = jnp.minimum(blk, total_blocks - 1)   # keep DMA in bounds
        return (blk, 0)

    kernel = functools.partial(
        _bce_dice_kernel,
        block_rows=block_rows,
        blocks_per_core=bpc,
        total_rows=rows,
        needs_mask=needs_mask,
    )

    partials = pl.pallas_call(
        kernel,
        out_shape=jax.ShapeDtypeStruct((num_splits, 3, _SUB, _LANE),
                                       jnp.float32),
        grid_spec=pltpu.PrefetchScalarGridSpec(
            num_scalar_prefetch=0,
            grid=(num_splits, bpc),
            in_specs=[
                pl.BlockSpec((block_rows, _LANE), in_map),
                pl.BlockSpec((block_rows, _LANE), in_map),
            ],
            out_specs=pl.BlockSpec((1, 3, _SUB, _LANE),
                                   lambda c, i: (c, 0, 0, 0)),
            scratch_shapes=[pltpu.VMEM((3, _SUB, _LANE), jnp.float32)],
        ),
        compiler_params=pltpu.CompilerParams(
            dimension_semantics=("parallel", "arbitrary")),
    )(p2, t2)

    # Tiny finalize in plain JAX: combine per-core / per-lane partials.
    sums = jnp.sum(partials, axis=(0, 2, 3))    # [sum(bce), sum(p*t), sum(p+t)]
    smooth = 1.0
    loss_ce = sums[0] / n
    loss_dice = 1.0 - (2.0 * sums[1] + smooth) / (sums[2] + smooth)
    return loss_ce + loss_dice


def _reference(pmask, rmask):
    """Plain-JAX reference matching the PyTorch module."""
    p = pmask.reshape(-1).astype(jnp.float32)
    t = rmask.reshape(-1).astype(jnp.float32)
    log_p = jnp.maximum(jnp.log(p), -100.0)
    log_1mp = jnp.maximum(jnp.log(1.0 - p), -100.0)
    loss_ce = jnp.mean(-(t * log_p + (1.0 - t) * log_1mp))
    smooth = 1.0
    inter = jnp.sum(p * t)
    loss_dice = 1.0 - (2.0 * inter + smooth) / (jnp.sum(p) + jnp.sum(t) + smooth)
    return loss_ce + loss_dice


if __name__ == "__main__":
    key = jax.random.PRNGKey(0)
    k1, k2, k3, k4 = jax.random.split(key, 4)

    # Small NCHW shape implied by the module.
    B, C, H, W = 2, 4, 16, 16
    pmask = jax.random.uniform(k1, (B, C, H, W), dtype=jnp.float32,
                               minval=1e-4, maxval=1.0 - 1e-4)
    rmask = (jax.random.uniform(k2, (B, C, H, W)) > 0.5).astype(jnp.float32)

    loss = bce_dice_loss(pmask, rmask)
    jax.block_until_ready(loss)
    ref = _reference(pmask, rmask)
    assert jnp.allclose(loss, ref, atol=1e-4, rtol=1e-4), (loss, ref)

    # Larger ragged shape: exercises multi-block grid, the 2-way core split,
    # the clamped index_map and the in-kernel tail mask.
    B2, C2, H2, W2 = 2, 4, 300, 250
    pmask2 = jax.random.uniform(k3, (B2, C2, H2, W2), dtype=jnp.float32,
                                minval=1e-4, maxval=1.0 - 1e-4)
    rmask2 = (jax.random.uniform(k4, (B2, C2, H2, W2)) > 0.5).astype(jnp.float32)
    loss2 = bce_dice_loss(pmask2, rmask2)
    jax.block_until_ready(loss2)
    ref2 = _reference(pmask2, rmask2)
    assert jnp.allclose(loss2, ref2, atol=1e-3, rtol=1e-3), (loss2, ref2)

    print("KERNEL_OK")
</pallas_src>

<mosaic_0001>
module attributes {stable_mosaic.version = 11 : i64} {
  func.func @_bce_dice_kernel(%arg0: i32, %arg1: i32, %arg2: memref<16x128xf32, #tpu.memory_space<vmem>>, %arg3: memref<16x128xf32, #tpu.memory_space<vmem>>, %arg4: memref<1x3x8x128xf32, #tpu.memory_space<vmem>>, %arg5: memref<3x8x128xf32, #tpu.memory_space<vmem>>) attributes {dimension_semantics = [#tpu.dimension_semantics<parallel>, #tpu.dimension_semantics<arbitrary>], iteration_bounds = array<i64: 1, 1>, scalar_prefetch = 0 : i64, scratch_operands = 1 : i64, tpu.core_type = #tpu.core_type<tc>, window_params = [{transform_indices = @transform_0, window_bounds = array<i64: 16, 128>}, {transform_indices = @transform_1, window_bounds = array<i64: 16, 128>}, {transform_indices = @transform_2, window_bounds = array<i64: 1, 3, 8, 128>}]} {
    %c0_i32 = arith.constant 0 : i32
    %0 = arith.cmpi eq, %arg1, %c0_i32 : i32
    %1 = arith.extui %0 : i1 to i32
    %c0_i32_0 = arith.constant 0 : i32
    %2 = arith.cmpi ne, %1, %c0_i32_0 : i32
    scf.if %2 {
      %cst_28 = arith.constant 0.000000e+00 : f32
      %47 = vector.broadcast %cst_28 : f32 to vector<3x8x128xf32>
      %c0_29 = arith.constant 0 : index
      %c0_30 = arith.constant 0 : index
      %c0_31 = arith.constant 0 : index
      %48 = vector.load %arg5[%c0_29, %c0_30, %c0_31] : memref<3x8x128xf32, #tpu.memory_space<vmem>>, vector<3x8x128xf32>
      tpu.vector_store %arg5[%c0_29, %c0_30, %c0_31], %47 {strides = array<i32>} : memref<3x8x128xf32, #tpu.memory_space<vmem>>, vector<3x8x128xf32>,
    } else {
    }
    %c0 = arith.constant 0 : index
    %c0_1 = arith.constant 0 : index
    %3 = vector.load %arg2[%c0, %c0_1] : memref<16x128xf32, #tpu.memory_space<vmem>>, vector<16x128xf32>
    %c0_2 = arith.constant 0 : index
    %c0_3 = arith.constant 0 : index
    %4 = vector.load %arg3[%c0_2, %c0_3] : memref<16x128xf32, #tpu.memory_space<vmem>>, vector<16x128xf32>
    %5 = math.log %3 : vector<16x128xf32>
    %cst = arith.constant -1.000000e+02 : f32
    %6 = vector.broadcast %cst : f32 to vector<16x128xf32>
    %7 = arith.maximumf %5, %6 : vector<16x128xf32>
    %cst_4 = arith.constant 1.000000e+00 : f32
    %8 = vector.broadcast %cst_4 : f32 to vector<16x128xf32>
    %9 = arith.subf %8, %3 : vector<16x128xf32>
    %10 = math.log %9 : vector<16x128xf32>
    %cst_5 = arith.constant -1.000000e+02 : f32
    %11 = vector.broadcast %cst_5 : f32 to vector<16x128xf32>
    %12 = arith.maximumf %10, %11 : vector<16x128xf32>
    %13 = arith.subf %7, %12 : vector<16x128xf32>
    %14 = arith.mulf %4, %13 : vector<16x128xf32>
    %15 = arith.addf %14, %12 : vector<16x128xf32>
    %cst_6 = arith.constant 0.000000e+00 : f32
    %16 = vector.broadcast %cst_6 : f32 to vector<16x128xf32>
    %17 = arith.subf %16, %15 : vector<16x128xf32>
    %18 = arith.mulf %3, %4 : vector<16x128xf32>
    %19 = arith.addf %3, %4 : vector<16x128xf32>
    %c0_7 = arith.constant 0 : index
    %c0_8 = arith.constant 0 : index
    %c0_9 = arith.constant 0 : index
    %20 = vector.load %arg5[%c0_7, %c0_8, %c0_9] : memref<3x8x128xf32, #tpu.memory_space<vmem>>, vector<1x8x128xf32>
    %21 = vector.shape_cast %20 : vector<1x8x128xf32> to vector<8x128xf32>
    %22 = vector.shape_cast %17 : vector<16x128xf32> to vector<2x8x128xf32>
    %cst_10 = arith.constant dense<0.000000e+00> : vector<8x128xf32>
    %23 = vector.multi_reduction <add>, %22, %cst_10 [0] : vector<2x8x128xf32> to vector<8x128xf32>
    %24 = arith.addf %21, %23 : vector<8x128xf32>
    %c0_11 = arith.constant 0 : index
    %c0_12 = arith.constant 0 : index
    %c0_13 = arith.constant 0 : index
    %25 = vector.load %arg5[%c0_11, %c0_12, %c0_13] : memref<3x8x128xf32, #tpu.memory_space<vmem>>, vector<1x8x128xf32>
    %26 = vector.shape_cast %25 : vector<1x8x128xf32> to vector<8x128xf32>
    %27 = vector.shape_cast %24 : vector<8x128xf32> to vector<1x8x128xf32>
    tpu.vector_store %arg5[%c0_11, %c0_12, %c0_13], %27 {strides = array<i32>} : memref<3x8x128xf32, #tpu.memory_space<vmem>>, vector<1x8x128xf32>,
    %c1 = arith.constant 1 : index
    %c0_14 = arith.constant 0 : index
    %c0_15 = arith.constant 0 : index
    %28 = vector.load %arg5[%c1, %c0_14, %c0_15] : memref<3x8x128xf32, #tpu.memory_space<vmem>>, vector<1x8x128xf32>
    %29 = vector.shape_cast %28 : vector<1x8x128xf32> to vector<8x128xf32>
    %30 = vector.shape_cast %18 : vector<16x128xf32> to vector<2x8x128xf32>
    %cst_16 = arith.constant dense<0.000000e+00> : vector<8x128xf32>
    %31 = vector.multi_reduction <add>, %30, %cst_16 [0] : vector<2x8x128xf32> to vector<8x128xf32>
    %32 = arith.addf %29, %31 : vector<8x128xf32>
    %c1_17 = arith.constant 1 : index
    %c0_18 = arith.constant 0 : index
    %c0_19 = arith.constant 0 : index
    %33 = vector.load %arg5[%c1_17, %c0_18, %c0_19] : memref<3x8x128xf32, #tpu.memory_space<vmem>>, vector<1x8x128xf32>
    %34 = vector.shape_cast %33 : vector<1x8x128xf32> to vector<8x128xf32>
    %35 = vector.shape_cast %32 : vector<8x128xf32> to vector<1x8x128xf32>
    tpu.vector_store %arg5[%c1_17, %c0_18, %c0_19], %35 {strides = array<i32>} : memref<3x8x128xf32, #tpu.memory_space<vmem>>, vector<1x8x128xf32>,
    %c2 = arith.constant 2 : index
    %c0_20 = arith.constant 0 : index
    %c0_21 = arith.constant 0 : index
    %36 = vector.load %arg5[%c2, %c0_20, %c0_21] : memref<3x8x128xf32, #tpu.memory_space<vmem>>, vector<1x8x128xf32>
    %37 = vector.shape_cast %36 : vector<1x8x128xf32> to vector<8x128xf32>
    %38 = vector.shape_cast %19 : vector<16x128xf32> to vector<2x8x128xf32>
    %cst_22 = arith.constant dense<0.000000e+00> : vector<8x128xf32>
    %39 = vector.multi_reduction <add>, %38, %cst_22 [0] : vector<2x8x128xf32> to vector<8x128xf32>
    %40 = arith.addf %37, %39 : vector<8x128xf32>
    %c2_23 = arith.constant 2 : index
    %c0_24 = arith.constant 0 : index
    %c0_25 = arith.constant 0 : index
    %41 = vector.load %arg5[%c2_23, %c0_24, %c0_25] : memref<3x8x128xf32, #tpu.memory_space<vmem>>, vector<1x8x128xf32>
    %42 = vector.shape_cast %41 : vector<1x8x128xf32> to vector<8x128xf32>
    %43 = vector.shape_cast %40 : vector<8x128xf32> to vector<1x8x128xf32>
    tpu.vector_store %arg5[%c2_23, %c0_24, %c0_25], %43 {strides = array<i32>} : memref<3x8x128xf32, #tpu.memory_space<vmem>>, vector<1x8x128xf32>,
    %c0_i32_26 = arith.constant 0 : i32
    %44 = arith.cmpi eq, %arg1, %c0_i32_26 : i32
    %45 = arith.extui %44 : i1 to i32
    %c0_i32_27 = arith.constant 0 : i32
    %46 = arith.cmpi ne, %45, %c0_i32_27 : i32
    scf.if %46 {
      %c0_28 = arith.constant 0 : index
      %c0_29 = arith.constant 0 : index
      %c0_30 = arith.constant 0 : index
      %47 = vector.load %arg5[%c0_28, %c0_29, %c0_30] : memref<3x8x128xf32, #tpu.memory_space<vmem>>, vector<3x8x128xf32>
      %c0_31 = arith.constant 0 : index
      %c0_32 = arith.constant 0 : index
      %c0_33 = arith.constant 0 : index
      %c0_34 = arith.constant 0 : index
      %48 = vector.load %arg4[%c0_31, %c0_32, %c0_33, %c0_34] : memref<1x3x8x128xf32, #tpu.memory_space<vmem>>, vector<1x3x8x128xf32>
      %49 = vector.shape_cast %48 : vector<1x3x8x128xf32> to vector<3x8x128xf32>
      %50 = vector.shape_cast %47 : vector<3x8x128xf32> to vector<1x3x8x128xf32>
      tpu.vector_store %arg4[%c0_31, %c0_32, %c0_33, %c0_34], %50 {strides = array<i32>} : memref<1x3x8x128xf32, #tpu.memory_space<vmem>>, vector<1x3x8x128xf32>,
    } else {
    }
    return
  }
  func.func @transform_0(%arg0: i32, %arg1: i32) -> (i32, i32) {
    %c1_i32 = arith.constant 1 : i32
    %0 = arith.muli %arg0, %c1_i32 : i32
    %1 = arith.addi %0, %arg1 : i32
    %c0_i32 = arith.constant 0 : i32
    %c0_i32_0 = arith.constant 0 : i32
    return %1, %c0_i32 : i32, i32
  }
  func.func @transform_1(%arg0: i32, %arg1: i32) -> (i32, i32) {
    %c1_i32 = arith.constant 1 : i32
    %0 = arith.muli %arg0, %c1_i32 : i32
    %1 = arith.addi %0, %arg1 : i32
    %c0_i32 = arith.constant 0 : i32
    %c0_i32_0 = arith.constant 0 : i32
    return %1, %c0_i32 : i32, i32
  }
  func.func @transform_2(%arg0: i32, %arg1: i32) -> (i32, i32, i32, i32) {
    %c0_i32 = arith.constant 0 : i32
    %c0_i32_0 = arith.constant 0 : i32
    %c0_i32_1 = arith.constant 0 : i32
    %c0_i32_2 = arith.constant 0 : i32
    return %arg0, %c0_i32, %c0_i32_0, %c0_i32_1 : i32, i32, i32, i32
  }
}

</mosaic_0001>

<bundles_post_ra>
// kernel: tpu_custom_call.1
= control target key start
LH: loop header
LB: loop body
LE: loop exit
PB: predicated region body
PF: predicated region fallthrough
CT: control target
= control target key end

     0   :  { %7 = vsyncpa [#allocation4], 0  ;;  %s247_s0 = inlined_call_operand.hbm [shape: f32[16,128], index: 0, kind: input, shape index: {}]   ;;  %s248_s1 = inlined_call_operand.hbm [shape: f32[16,128], index: 1, kind: input, shape index: {}]   ;;  %s249_s2 = inlined_call_operand.hbm [shape: f32[1,3,8,128], index: 2, kind: output, shape index: {}]  }
   0x1   :  { %8 = vsyncpa [#allocation7], 0 }
   0x2   :  { %9 = vsyncpa [#allocation5], 0  ;;  %s209_s9 = smov [#allocation3]  }
   0x3   :  { %s19_s10 = sshll.u32 %s209_s9, 4  ;;  %s20_s10 = int_to_ptr.vmem [resolvable:$true] %s19_s10 }
   0x4   :  { %s151_s11 = scalar_lea.vmem %s20_s10, 256  ;;  %p156_p1 = scmp.lt.s32.totalorder %s20_s10, %s20_s10 }
   0x5   :  { %p152_p0 = scmp.ne.s32.totalorder %s20_s10, %s151_s11  ;;  %p157_p2 = scmp.lt.s32.totalorder %s151_s11, %s151_s11 }
   0x7   :  { %p158_p3 = por %p157_p2, %p156_p1 }
   0x9   :  { %p159_p4 = pnand %p158_p3, %p152_p0 }
   0xb   :  { %162 = shalt.err (!%p159_p4)
}
   0xc   :  { %s210_s12 = smov 128   ;;  %s211_s13 = smov 8  }
   0xd   :  { %25 = dma.hbm_to_vmem [thread:$0]  %s247_s0, 256, %s20_s10, [#allocation4], %s210_s12, %s210_s12, %s211_s13  }
   0xe   :  { %s212_s16 = smov [#allocation6]  }
   0xf   :  { %s35_s17 = sshll.u32 %s212_s16, 4  ;;  %s36_s17 = int_to_ptr.vmem [resolvable:$true] %s35_s17 }
  0x10   :  { %s171_s18 = scalar_lea.vmem %s36_s17, 256  ;;  %p176_p6 = scmp.lt.s32.totalorder %s36_s17, %s36_s17 }
  0x11   :  { %p172_p5 = scmp.ne.s32.totalorder %s36_s17, %s171_s18  ;;  %p177_p7 = scmp.lt.s32.totalorder %s171_s18, %s171_s18 }
  0x13   :  { %p178_p8 = por %p177_p7, %p176_p6 }
  0x15   :  { %p179_p9 = pnand %p178_p8, %p172_p5 }
  0x17   :  { %182 = shalt.err (!%p179_p9)
}
  0x18   :  { %41 = dma.hbm_to_vmem [thread:$0]  %s248_s1, 256, %s36_s17, [#allocation7], %s210_s12, %s210_s12, %s211_s13  }
  0x19   :  { %203 = dma.done.wait [#allocation4], 256  }
  0x1a   :  { %204 = vsyncadd [#allocation4], 4294967040 }
  0x1b   :  { %205 = dma.done.wait [#allocation7], 256  }
  0x1c   :  { %206 = vsyncadd [#allocation7], 4294967040  ;;  %v59_v0 = vld [vmem:[#allocation3] sm:$0xff]  ;;  %v60_v1 = vld [vmem:[#allocation3 + $0x8] sm:$0xff]  ;;  %s213_s0 = smov [#allocation8]  }
  0x1d   :  { %v61_v2 = vld [vmem:[#allocation6] sm:$0xff]  ;;  %v62_v3 = vld [vmem:[#allocation6 + $0x8] sm:$0xff]  ;;  %135 = vlog2.f32 %v59_v0  ;;  %v69_v4 = vsub.f32 1.0, %v59_v0  ;;  %v70_v5 = vsub.f32 1.0, %v60_v1  ;;  %s117_s1 = sshll.u32 %s213_s0, 4  ;;  %s118_s1 = int_to_ptr.vmem [resolvable:$true] %s117_s1 }
  0x1e   :  { %v85_v6 = vmul.f32 %v61_v2, %v59_v0  ;;  %137 = vlog2.f32 %v60_v1  ;;  %v86_v7 = vmul.f32 %v62_v3, %v60_v1  ;;  %v87_v8 = vadd.f32 %v61_v2, %v59_v0  ;;  %s183_s21 = scalar_lea.vmem %s118_s1, 384  ;;  %p188_p11 = scmp.lt.s32.totalorder %s118_s1, %s118_s1 }
  0x1f   :  { %v88_v9 = vadd.f32 %v62_v3, %v60_v1  ;;  %139 = vlog2.f32 %v69_v4  ;;  %p184_p10 = scmp.ne.s32.totalorder %s118_s1, %s183_s21  ;;  %p189_p12 = scmp.lt.s32.totalorder %s183_s21, %s183_s21 }
  0x20   :  { %141 = vlog2.f32 %v70_v5  ;;  %v95_v10 = vadd.f32 %v86_v7, %v85_v6 }
  0x21   :  { %v100_v11 = vadd.f32 %v88_v9, %v87_v8  ;;  %p190_p13 = por %p189_p12, %p188_p11 }
  0x22   :  { %110 = vst [vmem:[#allocation8 + $0x8] sm:$0xff] %v95_v10 }
  0x23   :  { %111 = vst [vmem:[#allocation8 + $0x10] sm:$0xff] %v100_v11  ;;  %p191_p0 = pnand %p190_p13, %p184_p10 }
  0x2a   :  { %v136_v12 = vpop.eup %135 }
  0x2b   :  { %v138_v13 = vpop.eup %137  ;;  %v64_v14 = vmul.f32 0.6931472, %v136_v12 }
  0x2c   :  { %v140_v15 = vpop.eup %139  ;;  %v66_v16 = vmul.f32 0.6931472, %v138_v13 }
  0x2d   :  { %v142_v17 = vpop.eup %141  ;;  %v67_v18 = vmax.f32 %v64_v14, -100.0  ;;  %v72_v19 = vmul.f32 0.6931472, %v140_v15 }
  0x2e   :  { %v68_v20 = vmax.f32 %v66_v16, -100.0  ;;  %v74_v21 = vmul.f32 0.6931472, %v142_v17 }
  0x2f   :  { %v75_v22 = vmax.f32 %v72_v19, -100.0 }
  0x30   :  { %v76_v23 = vmax.f32 %v74_v21, -100.0 }
  0x31   :  { %v77_v24 = vsub.f32 %v67_v18, %v75_v22 }
  0x32   :  { %v78_v25 = vsub.f32 %v68_v20, %v76_v23 }
  0x33   :  { %v79_v26 = vmul.f32 %v77_v24, %v61_v2 }
  0x34   :  { %v80_v27 = vmul.f32 %v78_v25, %v62_v3 }
  0x35   :  { %v81_v28 = vadd.f32 %v79_v26, %v75_v22 }
  0x36   :  { %v82_v29 = vadd.f32 %v80_v27, %v76_v23 }
  0x37   :  { %v83_v30 = vsub.f32 0.0, %v81_v28 }
  0x38   :  { %v84_v31 = vsub.f32 0.0, %v82_v29 }
  0x3a   :  { %v90_v32 = vadd.f32 %v84_v31, %v83_v30 }
  0x3c   :  { %109 = vst [vmem:[#allocation8] sm:$0xff] %v90_v32 }
  0x3d   :  { %194 = shalt.err (!%p191_p0)
}
  0x3e   :  { %123 = dma.vmem_to_hbm [thread:$0]  %s118_s1, 384, %s249_s2, [#allocation5], %s210_s12, %s210_s12, %s211_s13  }
  0x3f   :  { %207 = dma.done.wait [#allocation5], 384  }
  0x40   :  { %208 = vsyncadd [#allocation5], 4294966912 }
  0x41   :  { %127 = vsyncpa [#allocation4], 1 }
  0x42   :  { %128 = vsyncpa [#allocation7], 1 }
  0x43   :  { %129 = vsyncpa [#allocation5], 1 }

</bundles_post_ra>
